<compile_context>
chip_gen: v5e
topology: v5e:2x2
jax: 0.10.0
libtpu: 0.0.40
codegen_flags: <defaults>
</compile_context>

<pallas_src>
import functools

import jax
import jax.numpy as jnp
from jax.experimental import pallas as pl
from jax.experimental.pallas import tpu as pltpu

_LANE = 128
_ROW_BLOCK_CAP = 1024   # rows of 128 lanes per grid step -> 128K elems/class/block


def _round_up(x, m):
    return (x + m - 1) // m * m


def _ce_weight_loss_kernel(x_ref, t_ref, out_ref, s0_ref, s1_ref, n1_ref,
                           *, hw, total, rows, needs_mask):
    n_blk = pl.program_id(0)
    j_blk = pl.program_id(1)

    @pl.when((n_blk == 0) & (j_blk == 0))
    def _init():
        s0_ref[...] = jnp.zeros_like(s0_ref)
        s1_ref[...] = jnp.zeros_like(s1_ref)
        n1_ref[...] = jnp.zeros_like(n1_ref)

    x0 = x_ref[0, 0]          # (rows, 128) f32 logits, class 0
    x1 = x_ref[0, 1]          # (rows, 128) f32 logits, class 1
    t = t_ref[0, 0]           # (rows, 128) int32 target in {0, 1}

    is1 = t != 0
    if needs_mask:
        r_ids = jax.lax.broadcasted_iota(jnp.int32, (rows, _LANE), 0) + j_blk * rows
        c_ids = jax.lax.broadcasted_iota(jnp.int32, (rows, _LANE), 1)
        valid = (r_ids * _LANE + c_ids) < hw
        sel1 = is1 & valid
        sel0 = (~is1) & valid
    else:
        sel1 = is1
        sel0 = ~is1

    # Stable softplus form of the 2-class cross entropy:
    #   t==0: lse - x0 = softplus(x1 - x0)
    #   t==1: lse - x1 = softplus(x0 - x1)
    d = x1 - x0
    s = jnp.where(is1, -d, d)
    nll = jnp.maximum(s, 0.0) + jnp.log(1.0 + jnp.exp(-jnp.abs(s)))

    zero = jnp.zeros_like(nll)
    s0_ref[...] += jnp.where(sel0, nll, zero)
    s1_ref[...] += jnp.where(sel1, nll, zero)
    n1_ref[...] += jnp.where(sel1, jnp.ones_like(nll), zero)

    @pl.when((n_blk == pl.num_programs(0) - 1) &
             (j_blk == pl.num_programs(1) - 1))
    def _finalize():
        s0 = jnp.sum(s0_ref[...])
        s1 = jnp.sum(s1_ref[...])
        n1 = jnp.sum(n1_ref[...])
        n0 = jnp.float32(total) - n1
        out_ref[0, 0] = (n1 * s0 + n0 * s1) / (2.0 * n0 * n1)


def ce_weight_loss(logits, target):
    """logits: (N, 2, H, W) float; target: (N, H, W) int in {0, 1}."""
    N, C, H, W = logits.shape
    assert C == 2, "CEWeightLoss builds a 2-element weight vector (binary)"
    hw = H * W
    hw_pad = _round_up(hw, _LANE)
    hw_rows = hw_pad // _LANE

    x = logits.astype(jnp.float32).reshape(N, 2, hw)
    t = target.astype(jnp.int32).reshape(N, 1, hw)
    if hw_pad != hw:
        # TODO(synk): odd H*W requires a pad copy; the common 128-aligned case is copy-free.
        x = jnp.pad(x, ((0, 0), (0, 0), (0, hw_pad - hw)))
        t = jnp.pad(t, ((0, 0), (0, 0), (0, hw_pad - hw)))
    x = x.reshape(N, 2, hw_rows, _LANE)
    t = t.reshape(N, 1, hw_rows, _LANE)

    rows = hw_rows if hw_rows <= _ROW_BLOCK_CAP else _ROW_BLOCK_CAP
    n_row_blocks = (hw_rows + rows - 1) // rows
    needs_mask = (hw_pad != hw) or (hw_rows % rows != 0)

    kernel = functools.partial(
        _ce_weight_loss_kernel,
        hw=hw, total=N * hw, rows=rows, needs_mask=needs_mask)

    # TODO(synk): on v7x, split the batch axis across the 2 TensorCores with
    # per-core partial-sum outputs combined in the wrapper for ~2x streaming BW.
    out = pl.pallas_call(
        kernel,
        out_shape=jax.ShapeDtypeStruct((1, 1), jnp.float32),
        grid=(N, n_row_blocks),
        in_specs=[
            pl.BlockSpec((1, 2, rows, _LANE), lambda n, j: (n, 0, j, 0)),
            pl.BlockSpec((1, 1, rows, _LANE), lambda n, j: (n, 0, j, 0)),
        ],
        out_specs=pl.BlockSpec(memory_space=pltpu.SMEM),
        scratch_shapes=[pltpu.VMEM((rows, _LANE), jnp.float32)] * 3,
        compiler_params=pltpu.CompilerParams(
            dimension_semantics=("arbitrary", "arbitrary")),
    )(x, t)
    return out[0, 0]


def _reference(logits, target):
    # pure-JAX reference of F.cross_entropy with dynamic class weights
    w_pos = jnp.mean(target.astype(jnp.float32))
    weights = jnp.stack([w_pos, 1.0 - w_pos]).astype(jnp.float32)
    logp = jax.nn.log_softmax(logits.astype(jnp.float32), axis=1)  # (N,2,H,W)
    ti = target.astype(jnp.int32)
    picked = jnp.take_along_axis(logp, ti[:, None, :, :], axis=1)[:, 0]  # (N,H,W)
    w_per = weights[ti]
    return jnp.sum(-w_per * picked) / jnp.sum(w_per)


if __name__ == "__main__":
    key = jax.random.PRNGKey(0)

    # primary small test (lane-aligned, copy-free path)
    k1, k2, k3, k4 = jax.random.split(key, 4)
    N, C, H, W = 2, 2, 16, 16
    logits = jax.random.normal(k1, (N, C, H, W), jnp.float32)
    target = jax.random.bernoulli(k2, p=0.3, shape=(N, H, W)).astype(jnp.int32)

    loss = jax.block_until_ready(ce_weight_loss(logits, target))
    ref = jax.block_until_ready(_reference(logits, target))
    assert jnp.allclose(loss, ref, atol=1e-5, rtol=1e-5), (loss, ref)

    # secondary test exercising the ragged-tail (iota mask) path
    H2, W2 = 10, 10
    logits2 = jax.random.normal(k3, (N, C, H2, W2), jnp.float32)
    target2 = jax.random.bernoulli(k4, p=0.3, shape=(N, H2, W2)).astype(jnp.int32)

    loss2 = jax.block_until_ready(ce_weight_loss(logits2, target2))
    ref2 = jax.block_until_ready(_reference(logits2, target2))
    assert jnp.allclose(loss2, ref2, atol=1e-5, rtol=1e-5), (loss2, ref2)

    print("KERNEL_OK")
</pallas_src>

<mosaic_0001>
module attributes {stable_mosaic.version = 11 : i64} {
  func.func @_ce_weight_loss_kernel(%arg0: i32, %arg1: i32, %arg2: memref<1x2x2x128xf32, #tpu.memory_space<vmem>>, %arg3: memref<1x1x2x128xi32, #tpu.memory_space<vmem>>, %arg4: memref<1x1xf32, #tpu.memory_space<smem>>, %arg5: memref<2x128xf32, #tpu.memory_space<vmem>>, %arg6: memref<2x128xf32, #tpu.memory_space<vmem>>, %arg7: memref<2x128xf32, #tpu.memory_space<vmem>>) attributes {dimension_semantics = [#tpu.dimension_semantics<arbitrary>, #tpu.dimension_semantics<arbitrary>], iteration_bounds = array<i64: 2, 1>, scalar_prefetch = 0 : i64, scratch_operands = 3 : i64, tpu.core_type = #tpu.core_type<tc>, window_params = [{transform_indices = @transform_0, window_bounds = array<i64: 1, 2, 2, 128>}, {transform_indices = @transform_1, window_bounds = array<i64: 1, 1, 2, 128>}, {transform_indices = @transform_2, window_bounds = array<i64: 1, 1>}]} {
    %c0_i32 = arith.constant 0 : i32
    %0 = arith.cmpi eq, %arg0, %c0_i32 : i32
    %c0_i32_0 = arith.constant 0 : i32
    %1 = arith.cmpi eq, %arg1, %c0_i32_0 : i32
    %2 = arith.andi %0, %1 : i1
    %3 = arith.extui %2 : i1 to i32
    %c0_i32_1 = arith.constant 0 : i32
    %4 = arith.cmpi ne, %3, %c0_i32_1 : i32
    scf.if %4 {
      %cst_33 = arith.constant 0.000000e+00 : f32
      %47 = vector.broadcast %cst_33 : f32 to vector<2x128xf32>
      %c0_34 = arith.constant 0 : index
      %c0_35 = arith.constant 0 : index
      %48 = vector.load %arg5[%c0_34, %c0_35] : memref<2x128xf32, #tpu.memory_space<vmem>>, vector<2x128xf32>
      tpu.vector_store %arg5[%c0_34, %c0_35], %47 {strides = array<i32>} : memref<2x128xf32, #tpu.memory_space<vmem>>, vector<2x128xf32>,
      %cst_36 = arith.constant 0.000000e+00 : f32
      %49 = vector.broadcast %cst_36 : f32 to vector<2x128xf32>
      %c0_37 = arith.constant 0 : index
      %c0_38 = arith.constant 0 : index
      %50 = vector.load %arg6[%c0_37, %c0_38] : memref<2x128xf32, #tpu.memory_space<vmem>>, vector<2x128xf32>
      tpu.vector_store %arg6[%c0_37, %c0_38], %49 {strides = array<i32>} : memref<2x128xf32, #tpu.memory_space<vmem>>, vector<2x128xf32>,
      %cst_39 = arith.constant 0.000000e+00 : f32
      %51 = vector.broadcast %cst_39 : f32 to vector<2x128xf32>
      %c0_40 = arith.constant 0 : index
      %c0_41 = arith.constant 0 : index
      %52 = vector.load %arg7[%c0_40, %c0_41] : memref<2x128xf32, #tpu.memory_space<vmem>>, vector<2x128xf32>
      tpu.vector_store %arg7[%c0_40, %c0_41], %51 {strides = array<i32>} : memref<2x128xf32, #tpu.memory_space<vmem>>, vector<2x128xf32>,
    } else {
    }
    %c0 = arith.constant 0 : index
    %c0_2 = arith.constant 0 : index
    %c0_3 = arith.constant 0 : index
    %c0_4 = arith.constant 0 : index
    %5 = vector.load %arg2[%c0, %c0_2, %c0_3, %c0_4] : memref<1x2x2x128xf32, #tpu.memory_space<vmem>>, vector<1x1x2x128xf32>
    %6 = vector.shape_cast %5 : vector<1x1x2x128xf32> to vector<2x128xf32>
    %c0_5 = arith.constant 0 : index
    %c1 = arith.constant 1 : index
    %c0_6 = arith.constant 0 : index
    %c0_7 = arith.constant 0 : index
    %7 = vector.load %arg2[%c0_5, %c1, %c0_6, %c0_7] : memref<1x2x2x128xf32, #tpu.memory_space<vmem>>, vector<1x1x2x128xf32>
    %8 = vector.shape_cast %7 : vector<1x1x2x128xf32> to vector<2x128xf32>
    %c0_8 = arith.constant 0 : index
    %c0_9 = arith.constant 0 : index
    %c0_10 = arith.constant 0 : index
    %c0_11 = arith.constant 0 : index
    %9 = vector.load %arg3[%c0_8, %c0_9, %c0_10, %c0_11] : memref<1x1x2x128xi32, #tpu.memory_space<vmem>>, vector<1x1x2x128xi32>
    %10 = vector.shape_cast %9 : vector<1x1x2x128xi32> to vector<2x128xi32>
    %c0_i32_12 = arith.constant 0 : i32
    %11 = vector.broadcast %c0_i32_12 : i32 to vector<2x128xi32>
    %12 = arith.cmpi ne, %10, %11 : vector<2x128xi32>
    %cst = arith.constant dense<true> : vector<2x128xi1>
    %13 = arith.xori %12, %cst : vector<2x128xi1>
    %14 = arith.subf %8, %6 : vector<2x128xf32>
    %cst_13 = arith.constant 0.000000e+00 : f32
    %15 = vector.broadcast %cst_13 : f32 to vector<2x128xf32>
    %16 = arith.subf %15, %14 : vector<2x128xf32>
    %17 = arith.select %12, %16, %14 : vector<2x128xi1>, vector<2x128xf32>
    %cst_14 = arith.constant 0.000000e+00 : f32
    %18 = vector.broadcast %cst_14 : f32 to vector<2x128xf32>
    %19 = arith.maximumf %17, %18 : vector<2x128xf32>
    %20 = math.absf %17 : vector<2x128xf32>
    %cst_15 = arith.constant 0.000000e+00 : f32
    %21 = vector.broadcast %cst_15 : f32 to vector<2x128xf32>
    %22 = arith.subf %21, %20 : vector<2x128xf32>
    %23 = math.exp %22 : vector<2x128xf32>
    %cst_16 = arith.constant 1.000000e+00 : f32
    %24 = vector.broadcast %cst_16 : f32 to vector<2x128xf32>
    %25 = arith.addf %24, %23 : vector<2x128xf32>
    %26 = math.log %25 : vector<2x128xf32>
    %27 = arith.addf %19, %26 : vector<2x128xf32>
    %cst_17 = arith.constant 0.000000e+00 : f32
    %28 = vector.broadcast %cst_17 : f32 to vector<2x128xf32>
    %c0_18 = arith.constant 0 : index
    %c0_19 = arith.constant 0 : index
    %29 = vector.load %arg5[%c0_18, %c0_19] : memref<2x128xf32, #tpu.memory_space<vmem>>, vector<2x128xf32>
    %30 = arith.select %13, %27, %28 : vector<2x128xi1>, vector<2x128xf32>
    %31 = arith.addf %29, %30 : vector<2x128xf32>
    %c0_20 = arith.constant 0 : index
    %c0_21 = arith.constant 0 : index
    %32 = vector.load %arg5[%c0_20, %c0_21] : memref<2x128xf32, #tpu.memory_space<vmem>>, vector<2x128xf32>
    tpu.vector_store %arg5[%c0_20, %c0_21], %31 {strides = array<i32>} : memref<2x128xf32, #tpu.memory_space<vmem>>, vector<2x128xf32>,
    %c0_22 = arith.constant 0 : index
    %c0_23 = arith.constant 0 : index
    %33 = vector.load %arg6[%c0_22, %c0_23] : memref<2x128xf32, #tpu.memory_space<vmem>>, vector<2x128xf32>
    %34 = arith.select %12, %27, %28 : vector<2x128xi1>, vector<2x128xf32>
    %35 = arith.addf %33, %34 : vector<2x128xf32>
    %c0_24 = arith.constant 0 : index
    %c0_25 = arith.constant 0 : index
    %36 = vector.load %arg6[%c0_24, %c0_25] : memref<2x128xf32, #tpu.memory_space<vmem>>, vector<2x128xf32>
    tpu.vector_store %arg6[%c0_24, %c0_25], %35 {strides = array<i32>} : memref<2x128xf32, #tpu.memory_space<vmem>>, vector<2x128xf32>,
    %c0_26 = arith.constant 0 : index
    %c0_27 = arith.constant 0 : index
    %37 = vector.load %arg7[%c0_26, %c0_27] : memref<2x128xf32, #tpu.memory_space<vmem>>, vector<2x128xf32>
    %cst_28 = arith.constant 1.000000e+00 : f32
    %38 = vector.broadcast %cst_28 : f32 to vector<2x128xf32>
    %39 = arith.select %12, %38, %28 : vector<2x128xi1>, vector<2x128xf32>
    %40 = arith.addf %37, %39 : vector<2x128xf32>
    %c0_29 = arith.constant 0 : index
    %c0_30 = arith.constant 0 : index
    %41 = vector.load %arg7[%c0_29, %c0_30] : memref<2x128xf32, #tpu.memory_space<vmem>>, vector<2x128xf32>
    tpu.vector_store %arg7[%c0_29, %c0_30], %40 {strides = array<i32>} : memref<2x128xf32, #tpu.memory_space<vmem>>, vector<2x128xf32>,
    %c1_i32 = arith.constant 1 : i32
    %42 = arith.cmpi eq, %arg0, %c1_i32 : i32
    %c0_i32_31 = arith.constant 0 : i32
    %43 = arith.cmpi eq, %arg1, %c0_i32_31 : i32
    %44 = arith.andi %42, %43 : i1
    %45 = arith.extui %44 : i1 to i32
    %c0_i32_32 = arith.constant 0 : i32
    %46 = arith.cmpi ne, %45, %c0_i32_32 : i32
    scf.if %46 {
      %c0_33 = arith.constant 0 : index
      %c0_34 = arith.constant 0 : index
      %47 = vector.load %arg5[%c0_33, %c0_34] : memref<2x128xf32, #tpu.memory_space<vmem>>, vector<2x128xf32>
      %48 = vector.shape_cast %47 : vector<2x128xf32> to vector<1x2x128xf32>
      %cst_35 = arith.constant dense<0.000000e+00> : vector<1xf32>
      %49 = vector.multi_reduction <add>, %48, %cst_35 [1, 2] : vector<1x2x128xf32> to vector<1xf32>
      %50 = vector.shape_cast %49 : vector<1xf32> to vector<1x1x1xf32>
      %51 = vector.extract %50[0, 0, 0] : f32 from vector<1x1x1xf32>
      %c0_36 = arith.constant 0 : index
      %c0_37 = arith.constant 0 : index
      %52 = vector.load %arg6[%c0_36, %c0_37] : memref<2x128xf32, #tpu.memory_space<vmem>>, vector<2x128xf32>
      %53 = vector.shape_cast %52 : vector<2x128xf32> to vector<1x2x128xf32>
      %cst_38 = arith.constant dense<0.000000e+00> : vector<1xf32>
      %54 = vector.multi_reduction <add>, %53, %cst_38 [1, 2] : vector<1x2x128xf32> to vector<1xf32>
      %55 = vector.shape_cast %54 : vector<1xf32> to vector<1x1x1xf32>
      %56 = vector.extract %55[0, 0, 0] : f32 from vector<1x1x1xf32>
      %c0_39 = arith.constant 0 : index
      %c0_40 = arith.constant 0 : index
      %57 = vector.load %arg7[%c0_39, %c0_40] : memref<2x128xf32, #tpu.memory_space<vmem>>, vector<2x128xf32>
      %58 = vector.shape_cast %57 : vector<2x128xf32> to vector<1x2x128xf32>
      %cst_41 = arith.constant dense<0.000000e+00> : vector<1xf32>
      %59 = vector.multi_reduction <add>, %58, %cst_41 [1, 2] : vector<1x2x128xf32> to vector<1xf32>
      %60 = vector.shape_cast %59 : vector<1xf32> to vector<1x1x1xf32>
      %61 = vector.extract %60[0, 0, 0] : f32 from vector<1x1x1xf32>
      %cst_42 = arith.constant 5.120000e+02 : f32
      %62 = arith.subf %cst_42, %61 : f32
      %63 = arith.mulf %61, %51 : f32
      %64 = arith.mulf %62, %56 : f32
      %65 = arith.addf %63, %64 : f32
      %cst_43 = arith.constant 2.000000e+00 : f32
      %66 = arith.mulf %cst_43, %62 : f32
      %67 = arith.mulf %66, %61 : f32
      %68 = arith.divf %65, %67 : f32
      %c0_44 = arith.constant 0 : index
      %c0_45 = arith.constant 0 : index
      %69 = memref.load %arg4[%c0_44, %c0_45] : memref<1x1xf32, #tpu.memory_space<smem>>
      memref.store %68, %arg4[%c0_44, %c0_45] : memref<1x1xf32, #tpu.memory_space<smem>>
    } else {
    }
    return
  }
  func.func @transform_0(%arg0: i32, %arg1: i32) -> (i32, i32, i32, i32) {
    %c0_i32 = arith.constant 0 : i32
    %c0_i32_0 = arith.constant 0 : i32
    %c0_i32_1 = arith.constant 0 : i32
    return %arg0, %c0_i32, %arg1, %c0_i32_0 : i32, i32, i32, i32
  }
  func.func @transform_1(%arg0: i32, %arg1: i32) -> (i32, i32, i32, i32) {
    %c0_i32 = arith.constant 0 : i32
    %c0_i32_0 = arith.constant 0 : i32
    %c0_i32_1 = arith.constant 0 : i32
    return %arg0, %c0_i32, %arg1, %c0_i32_0 : i32, i32, i32, i32
  }
  func.func @transform_2(%arg0: i32, %arg1: i32) -> (i32, i32) {
    %c0_i32 = arith.constant 0 : i32
    %c0_i32_0 = arith.constant 0 : i32
    %c0_i32_1 = arith.constant 0 : i32
    return %c0_i32, %c0_i32_0 : i32, i32
  }
}

</mosaic_0001>

<bundles_post_ra>
// kernel: tpu_custom_call.1
= control target key start
LH: loop header
LB: loop body
LE: loop exit
PB: predicated region body
PF: predicated region fallthrough
CT: control target
= control target key end

     0   :  { %7 = vsyncpa [#allocation6], 0  ;;  %s781_s0 = inlined_call_operand.hbm [shape: f32[2,2,2,128], index: 0, kind: input, shape index: {}]   ;;  %s782_s1 = inlined_call_operand.hbm [shape: s32[2,1,2,128], index: 1, kind: input, shape index: {}]   ;;  %s783_s2 = inlined_call_operand.hbm [shape: f32[1,1], index: 2, kind: output, shape index: {}]  }
   0x1   :  { %9 = vsyncpa [#allocation6 + $0x1], 0 }
   0x2   :  { %10 = vsyncpa [#allocation9], 0 }
   0x3   :  { %12 = vsyncpa [#allocation9 + $0x1], 0 }
   0x4   :  { %13 = vsyncpa [#allocation7], 0  ;;  %s667_s9 = smov 0   ;;  %s669_s10 = smov 0  }
   0x5   :  { %s671_s11 = smov 0   ;;  %s673_s12 = smov 0  }
   0x6   :  { %s675_s13 = smov 0   ;;  %s677_s14 = smov 0  }
   0x7 LB: > { %s405_s15 = sadd.s32 4294967295, %s644_s14   ;;  %s31_s16 = sadd.s32 1, %s640_s13  ;;  %s644_s14 = sphi %s677_s14, %s19_s14   ;;  %s640_s13 = sphi %s675_s13, %s791_s13   ;;  %s636_s12 = sphi %s673_s12, %s790_s12   ;;  %s632_s11 = sphi %s671_s11, %s789_s11   ;;  %s628_s10 = sphi %s669_s10, %s788_s10   ;;  %s624_s9 = sphi %s667_s9, %s787_s9  }
   0x8   : > { %p33_p0 = scmp.ge.s32.totalorder %s31_s16, 2  ;;  %s40_s17 = sadd.s32 1, %s632_s11 }
   0x9   : > { %p47_p1 = scmp.ne.s32.totalorder %s632_s11, %s628_s10  ;;  %p48_p2 = scmp.eq.s32.totalorder %s644_s14, 0 }
   0xa   : > { %s793_s16 = smov (%p33_p0, %s31_s16), 0  ;;  %p53_p4 = scmp.ne.s32.totalorder %s628_s10, %s624_s9 }
   0xb   : > { %p703_p3 = por %p48_p2, %p47_p1  ;;  %s35_s19 = ssub.s32 %s640_s13, %s793_s16 }
   0xc   : > { %p54_p5 = scmp.eq.s32.totalorder %s405_s15, 0  ;;  %p38_p6 = scmp.eq.s32.totalorder %s35_s19, 0 }
   0xd   : > { %p449_p8 = scmp.lt.s32.totalorder %s644_s14, 2  ;;  %s126_s22 = sand.u32 1, %s632_s11  }
   0xe   : > { %p712_p7 = por %p54_p5, %p53_p4  ;;  %s423_s23 = sshll.u32 %s640_s13, 2 }
   0xf   : > { %s718_s21 = scalar_select %p38_p6, %s632_s11, %s40_s17  }
  0x10   : > { %s408_s24 = sshll.u32 %s126_s22, 2  ;;  %s136_s27 = scalar_lea.hbm %s781_s0, %s423_s23 }
  0x11   : > { %s137_s28 = sshll.u32 %s136_s27, 4  ;;  %s130_s29 = scalar_lea.vmem [#allocation5], %s408_s24  ;;  %s138_s28 = int_to_ptr.hbm [resolvable:$true] %s137_s28 }
  0x12   : > { %s139_s30 = sshll.u32 %s130_s29, 4  ;;  %p727_p9 = pnand %p449_p8, %p703_p3  ;;  %s140_s30 = int_to_ptr.vmem [resolvable:$true] %s139_s30 }
  0x13   : > { %p413_p10 = scmp.ge.s32.totalorder %s644_s14, 1  ;;  %p167_p11 = scmp.lt.s32.totalorder %s644_s14, 3 }
  0x14   : > { %s127_s4 = scalar_lea.sflag [#allocation6], %s126_s22  ;;  %s646_s5 = smov 32  }
  0x15   : > { %s647_s6 = smov 2   ;;  %p168_p12 = pnand %p413_p10, %p167_p11 }
  0x16   : > { %445 = dma.hbm_to_vmem [thread:$0]  (!%p727_p9), %s138_s28, 64, %s140_s30, %s127_s4, %s646_s5, %s646_s5, %s647_s6  }
  0x17   : > { %s411_s7 = sshll.u32 %s126_s22, 1  ;;  %s412_s8 = sshll.u32 %s640_s13, 1 }
  0x18   : > { %s158_s18 = scalar_lea.hbm %s782_s1, %s412_s8  ;;  %s153_s23 = scalar_lea.vmem [#allocation8], %s411_s7 }
  0x19   : > { %s160_s19 = sshll.u32 %s158_s18, 4  ;;  %s162_s24 = sshll.u32 %s153_s23, 4  ;;  %s161_s19 = int_to_ptr.hbm [resolvable:$true] %s160_s19  ;;  %s163_s24 = int_to_ptr.vmem [resolvable:$true] %s162_s24 }
  0x1a   : > { %s150_s25 = scalar_lea.sflag [#allocation9], %s126_s22  ;;  %171 = sbr.rel (%p168_p12) target bundleno = 356 (0x164), region = 28 }
  0x1b   : > { %448 = dma.hbm_to_vmem [thread:$0]  (!%p727_p9), %s161_s19, 32, %s163_s24, %s150_s25  }
  0x1c   : > { %s173_s26 = sand.u32 (!%p168_p12), 1, %s628_s10  }
  0x1d   : > { %s414_s27 = sshll.u32 (!%p168_p12), %s173_s26, 2  ;;  %s174_s28 = scalar_lea.sflag (!%p168_p12), [#allocation6], %s173_s26 }
  0x1e   : > { %s177_s29 = scalar_lea.vmem (!%p168_p12), [#allocation5], %s414_s27 }
  0x1f   : > { %611 = dma.done.wait (%p712_p7), %s174_s28, 64  }
  0x20   : > { %613 = vsyncadd (%p712_p7), %s174_s28, 4294967232  ;;  %s415_s30 = sshll.u32 %s173_s26, 1  ;;  %s184_s4 = scalar_lea.sflag [#allocation9], %s173_s26 }
  0x21   : > { %s187_s5 = scalar_lea.vmem [#allocation8], %s415_s30 }
  0x22   : > { %615 = dma.done.wait (%p712_p7), %s184_s4, 32  }
  0x23   : > { %617 = vsyncadd (%p712_p7), %s184_s4, 4294967264  ;;  %p209_p13 = scmp.eq.s32.totalorder %s636_s12, 0 }
  0x24   : > { %v648_v0 = vmov (%p209_p13), 0.0  }
  0x25   : > { %214 = sbr.rel (!%p209_p13) target bundleno = 42 (0x2a), region = 40  ;;  %215 = vst [vmem:[#allocation2] sm:$0x3] (%p209_p13), %v648_v0 }
  0x26   : > { %216 = vst [vmem:[#allocation3] sm:$0x3] (%p209_p13), %v648_v0 }
  0x27   : > { %217 = vst [vmem:[#allocation4] sm:$0x3] (%p209_p13), %v648_v0 }
  0x2a PF: > { %v218_v1 = vld [vmem:[%s177_s29] sm:$0x3]  ;;  %v417_v2 = vld [vmem:[%s177_s29 + $0x2] sm:$0x3]  ;;  %v221_v3 = vld [vmem:[%s187_s5] sm:$0x3] }
  0x2b   : > { %v224_v4 = vsub.f32 %v417_v2, %v218_v1  ;;  %vm222_vm0 = vcmp.ne.s32.totalorder %v221_v3, 0  ;;  %p248_p0 = scmp.eq.s32.totalorder %s636_s12, 1  ;;  %v649_v7 = vmov 0.0   ;;  %vm650_vm1 = vmmov 1  }
  0x2c   : > { %v245_v8 = vsel %vm222_vm0, 1.0, %v649_v7  ;;  %vm223_vm2 = vmxor %vm222_vm0, %vm650_vm1  ;;  %v236_v20 = vld [vmem:[#allocation2] sm:$0x3]  ;;  %vm254_vm3 = vcmask (%p248_p0), 1041408  }
  0x2d   : > { %v225_v6 = vsub.f32 0.0, %v224_v4  ;;  %v240_v21 = vld [vmem:[#allocation3] sm:$0x3] }
  0x2e   : > { %v244_v5 = vld [vmem:[#allocation4] sm:$0x3] }
  0x2f   : > { %v246_v9 = vadd.f32 %v245_v8, %v244_v5  ;;  %v226_v10 = vsel %vm222_vm0, %v225_v6, %v224_v4 }
  0x30   : > { %v228_v11 = vand.u32 2147483647, %v226_v10  ;;  %v227_v16 = vmax.f32 %v226_v10, 0.0 }
  0x31   : > { %247 = vst [vmem:[#allocation4] sm:$0x3] %v246_v9 }
  0x32   : > { %v229_v12 = vsub.f32 0.0, %v228_v11 }
  0x34   : > { %v230_v13 = vmul.f32 1.442695, %v229_v12 }
  0x36   : > { %506 = vpow2.f32 %v230_v13 }
  0x38   : > { %v276_v27 = vld [vmem:[#allocation4] sm:$0x3] (%p248_p0) }
  0x39   : > { %v277_v29 = vsel (%p248_p0), %vm254_vm3, %v276_v27, 0.0 }
  0x3a   : > { %278 = vadd.xlane.f32.xlu1 (%p248_p0), %v277_v29 }
  0x3c   : > { %v507_v14 = vpop.eup %506 }
  0x3d   : > { %v232_v15 = vadd.f32 1.0, %v507_v14 }
  0x3f   : > { %508 = vlog2.f32 %v232_v15 }
  0x45   : > { %v509_v17 = vpop.eup %508 }
  0x46   : > { %v234_v18 = vmul.f32 0.6931472, %v509_v17 }
  0x48   : > { %v235_v19 = vadd.f32 %v234_v18, %v227_v16 }
  0x4a   : > { %v237_v22 = vsel %vm223_vm2, %v235_v19, 0.0  ;;  %v241_v23 = vsel %vm222_vm0, %v235_v19, 0.0  ;;  %252 = sbr.rel (!%p248_p0) target bundleno = 350 (0x15e), region = 44 }
  0x4b   : > { %v238_v24 = vadd.f32 %v237_v22, %v236_v20  ;;  %v242_v25 = vadd.f32 %v241_v23, %v240_v21 }
  0x4d   : > { %239 = vst [vmem:[#allocation2] sm:$0x3] %v238_v24 }
  0x4e   : > { %243 = vst [vmem:[#allocation3] sm:$0x3] %v242_v25 }
  0x54   : > { %v253_v26 = vld [vmem:[#allocation2] sm:$0x3] }
  0x55   : > { %v255_v28 = vsel %vm254_vm3, %v253_v26, 0.0  ;;  %v265_v30 = vld [vmem:[#allocation3] sm:$0x3] }
  0x56   : > { %256 = vadd.xlane.f32.xlu0 %v255_v28  ;;  %v266_v31 = vsel %vm254_vm3, %v265_v30, 0.0 }
  0x5e   : > { %267 = vadd.xlane.f32.xlu0 %v266_v31 }
  0xad   : > { %v279_v33 = vpop.xlane.xlu1 %278 }
  0xae   : > { %v280_v35 = vrot.slane %v279_v33, 4 }
  0xb0   : > { %v281_v37 = vadd.f32 %v280_v35, %v279_v33 }
  0xb2   : > { %v282_v40 = vrot.slane %v281_v37, 2 }
  0xb4   : > { %v283_v46 = vadd.f32 %v282_v40, %v281_v37 }
  0xb6   : > { %v284_v49 = vrot.slane %v283_v46, 1 }
  0xb8   : > { %v285_v52 = vadd.f32 %v284_v49, %v283_v46 }
  0xc9   : > { %v257_v32 = vpop.xlane.xlu0 %256 }
  0xca   : > { %v258_v34 = vrot.slane %v257_v32, 4 }
  0xcc   : > { %v259_v36 = vadd.f32 %v258_v34, %v257_v32 }
  0xce   : > { %v260_v38 = vrot.slane %v259_v36, 2 }
  0xd0   : > { %v261_v39 = vadd.f32 %v260_v38, %v259_v36 }
  0xd1   : > { %v268_v41 = vpop.xlane.xlu0 %267 }
  0xd2   : > { %v269_v42 = vrot.slane %v268_v41, 4  ;;  %v262_v43 = vrot.slane %v261_v39, 1 }
  0xd4   : > { %v270_v44 = vadd.f32 %v269_v42, %v268_v41  ;;  %v263_v45 = vadd.f32 %v262_v43, %v261_v39 }
  0xd6   : > { %v271_v47 = vrot.slane %v270_v44, 2  ;;  %426 = vpush %v263_v45 }
  0xd8   : > { %v272_v48 = vadd.f32 %v271_v47, %v270_v44 }
  0xda   : > { %v273_v50 = vrot.slane %v272_v48, 1 }
  0xdc   : > { %v274_v51 = vadd.f32 %v273_v50, %v272_v48 }
  0xde   : > { %428 = vpush %v274_v51 }
  0xdf   : > { %430 = vpush %v285_v52 }
 0x107   : > { %s427_s12 = spop %426 }
 0x10f   : > { %s429_s20 = spop %428 }
 0x110   : > { %s431_s22 = spop %430 }
 0x111   : > { %s287_s3 = ssub.f32 512.0, %s431_s22  ;;  %s288_s6 = smul.f32 %s431_s22, %s427_s12 }
 0x113   : > { %s291_s7 = smul.f32 2.0, %s287_s3 }
 0x114   : > { %s289_s8 = smul.f32 %s429_s20, %s287_s3 }
 0x115   : > { %s292_s9 = smul.f32 %s431_s22, %s291_s7 }
 0x116   : > { %s290_s17 = sadd.f32 %s289_s8, %s288_s6 }
 0x117   : > { %v293_v53 = vstv %s292_s9 }
 0x118   : > { %510 = vrcp.f32 %v293_v53  ;;  %v305_v57 = vand.u32 2147483648, %v293_v53  ;;  %v303_v59 = vand.u32 2147483647, %v293_v53  ;;  %vm299_vm5 = vweird.f32 %v293_v53 }
 0x11a   : > { %v306_v61 = vor.u32 1.1754944e-38, %v305_v57  ;;  %vm304_vm7 = vcmp.eq.f32.partialorder %v303_v59, 8.507059e+37 }
 0x11e   : > { %v511_v54 = vpop.eup %510 }
 0x11f   : > { %v295_v55 = vmul.f32 %v511_v54, %v293_v53  ;;  %vm300_vm4 = vweird.f32 %v511_v54 }
 0x120   : > { %vm301_vm6 = vmor %vm299_vm5, %vm300_vm4 }
 0x121   : > { %v296_v56 = vsub.f32 1.0, %v295_v55 }
 0x123   : > { %v297_v58 = vmul.f32 %v511_v54, %v296_v56 }
 0x125   : > { %v298_v60 = vadd.f32 %v511_v54, %v297_v58 }
 0x127   : > { %v302_v62 = vsel %vm301_vm6, %v511_v54, %v298_v60 }
 0x128   : > { %v307_v63 = vsel %vm304_vm7, %v306_v61, %v302_v62 }
 0x129   : > { %432 = vpush %v307_v63 }
 0x15a   : > { %s433_s18 = spop %432 }
 0x15b   : > { %s309_s19 = smul.f32 %s433_s18, %s290_s17 }
 0x15d   : > { %311 = sst [smem:[#allocation10]] %s309_s19 }
 0x15e PF: > { %p450_p1 = scmp.eq.s32.totalorder %s405_s15, 1  ;;  %s318_s25 = sshll.u32 %s783_s2, 4  ;;  %s319_s25 = int_to_ptr.hbm [resolvable:$true] %s318_s25 }
 0x15f   : > { %s651_s26 = smov [#allocation10]  }
 0x160   : > { %439 = dma.smem_to_hbm (%p450_p1), %s651_s26, 16, %s319_s25, [#allocation7]  }
 0x161   : > { %619 = dma.done.wait (%p450_p1), [#allocation7], 16  }
 0x162   : > { %621 = vsyncadd (%p450_p1), [#allocation7], 4294967280 }
 0x163   : > { %327 = sfence }
 0x164 PF: > { %s19_s14 = sadd.s32 1, %s644_s14   ;;  %s787_s9 = smov %s628_s10 }
 0x165   : > { %p16_p2 = scmp.ge.s32.totalorder %s19_s14, 4   ;;  %s788_s10 = smov %s632_s11 }
 0x166   : > { %s789_s11 = smov %s718_s21  ;;  %s790_s12 = smov %s640_s13 }
 0x167   : > { %s791_s13 = smov %s793_s16  ;;  %18 = sbr.rel (!%p16_p2) target bundleno = 7 (0x7), region = 88 }
 0x16c   :  { %333 = vsyncpa [#allocation6], 1 }
 0x16d   :  { %335 = vsyncpa [#allocation6 + $0x1], 1 }
 0x16e   :  { %336 = vsyncpa [#allocation9], 1 }
 0x16f   :  { %338 = vsyncpa [#allocation9 + $0x1], 1 }
 0x170   :  { %339 = vsyncpa [#allocation7], 1 }
 0x171   :  { %341 = vsyncpa [#allocation7 + $0x1], 1 }

</bundles_post_ra>
